<compile_context>
chip_gen: v6e
topology: v6e:2x2x1
jax: 0.10.0
libtpu: 0.0.40
codegen_flags: <defaults>
</compile_context>

<pallas_src>
import math
from functools import partial

import jax
import jax.numpy as jnp
from jax import lax
from jax.experimental import pallas as pl
from jax.experimental.pallas import tpu as pltpu


def _round_up(n, m):
    return (n + m - 1) // m * m


def _prenorm_kernel(x_ref, w_ref, b_ref, o_ref, *, eps):
    # x_ref: (1, C, TL) native dtype      one (batch, L-tile) block
    # w_ref: (C_out, C) bf16              1x1-conv weight with g*sqrt(C) folded in
    # b_ref: (C_out, 1) f32               1x1-conv bias
    # o_ref: (1, C_out, TL)
    x = x_ref[0]                                              # (C, TL)

    # F.normalize(x, dim=1): divide by max(||x||_2, eps) over the channel axis.
    # max(sqrt(s), eps) == sqrt(max(s, eps^2)) -> one rsqrt per lane column (EUP).
    x_f32 = x.astype(jnp.float32)
    sumsq = jnp.sum(x_f32 * x_f32, axis=0, keepdims=True)     # (1, TL)  VPU+XLU
    inv = lax.rsqrt(jnp.maximum(sumsq, eps * eps))            # (1, TL)  EUP

    # MXU matmul on the *un-normalized* tile; the column scale commutes with
    # the contraction over C, so it is applied to the (C_out, TL) result.
    # For bf16 x the astype is a no-op and x feeds the MXU directly.
    y = jnp.dot(w_ref[...], x.astype(jnp.bfloat16),
                preferred_element_type=jnp.float32)           # (C_out, TL)

    o_ref[0] = (y * inv + b_ref[...]).astype(o_ref.dtype)


_VMEM_WORKSET_BUDGET = 24 << 20     # fits the scoped-VMEM default on v5e/v6e/v7x
_SINGLE_BUFFER_W_BYTES = 4 << 20    # single-buffer resident weight when this large


def prenorm_conv1x1(x, g, w, b, *, tl_target=1024):
    """PreNorm(dim, Conv1d(dim, dim, 1)) forward.

    x: (B, C, L) f32 or bf16 ; g: (1, C, 1) RMSNorm gain ; w: (C_out, C) ; b: (C_out,)
    Output has the same dtype as x.
    """
    B, C, L = x.shape
    C_out = w.shape[0]
    scale = math.sqrt(C)           # x.shape[1] ** 0.5
    eps = 1e-12                    # F.normalize default eps

    # Fold RMSNorm gain and sqrt(C) into the conv weight (per-channel column
    # scale commutes with the contraction over C).
    w_folded = w.astype(jnp.float32) * (scale * g.reshape(1, C).astype(jnp.float32))
    w_bf16 = w_folded.astype(jnp.bfloat16)
    b2 = b.reshape(C_out, 1).astype(jnp.float32)

    # --- VMEM-adaptive L tile (multiple of 128, lane-dense stores) ---
    x_bytes = jnp.dtype(x.dtype).itemsize
    o_bytes = x_bytes
    w_vmem = C_out * C * 2                               # bf16 weight bytes
    single_buffer_w = w_vmem >= _SINGLE_BUFFER_W_BYTES   # v7x / large-C relief
    fixed = (w_vmem if single_buffer_w else 2 * w_vmem) + 2 * C_out * 4
    per_col = 2 * (C * x_bytes + C_out * o_bytes)        # double-buffered x & out tiles
    tl_fit = (_VMEM_WORKSET_BUDGET - fixed) // per_col
    tl_fit = max(128, (tl_fit // 128) * 128)

    l128 = _round_up(L, 128)
    TL = max(128, min(tl_target, l128, tl_fit))

    # Keep >= 2 grid steps when possible so both v7x TensorCores get work.
    if B == 1 and l128 > 128 and _round_up(L, TL) // TL < 2:
        TL = _round_up(l128 // 2, 128)

    L_pad = _round_up(L, TL)
    x_in = jnp.pad(x, ((0, 0), (0, 0), (0, L_pad - L))) if L_pad != L else x
    # Padded columns: sumsq == 0 -> inv = 1/eps, but y column is exactly 0, so
    # 0 * inv = 0 (no NaNs); padding is sliced off below.

    est_vmem = fixed + per_col * TL
    vmem_limit = int(min(max(est_vmem + (8 << 20), 32 << 20), 56 << 20))

    if single_buffer_w:
        # Constant index_map => fetched once; a single buffer frees VMEM
        # (matters for large C on v7x's 64 MiB physical VMEM).
        def resident(shape):
            return pl.BlockSpec(shape, lambda bi, li: (0, 0),
                                pipeline_mode=pl.Buffered(1))
    else:
        def resident(shape):
            return pl.BlockSpec(shape, lambda bi, li: (0, 0))

    kernel = partial(_prenorm_kernel, eps=eps)

    out = pl.pallas_call(
        kernel,
        out_shape=jax.ShapeDtypeStruct((B, C_out, L_pad), x.dtype),
        grid_spec=pltpu.PrefetchScalarGridSpec(
            num_scalar_prefetch=0,
            grid=(B, L_pad // TL),
            in_specs=[
                pl.BlockSpec((1, C, TL), lambda bi, li: (bi, 0, li)),
                resident((C_out, C)),      # VMEM-resident across the grid
                resident((C_out, 1)),      # VMEM-resident across the grid
            ],
            out_specs=pl.BlockSpec((1, C_out, TL), lambda bi, li: (bi, 0, li)),
        ),
        compiler_params=pltpu.CompilerParams(
            dimension_semantics=("parallel", "parallel"),
            vmem_limit_bytes=vmem_limit),
    )(x_in, w_bf16, b2)

    return out[:, :, :L] if L_pad != L else out


def prenorm_reference(x, g, w, b):
    """Pure-JAX f32 reference of PreNorm(dim, Conv1d(dim, dim, 1))."""
    C = x.shape[1]
    nrm = jnp.maximum(jnp.sqrt(jnp.sum(x * x, axis=1, keepdims=True)), 1e-12)
    xn = x / nrm * g * math.sqrt(C)
    return jnp.einsum('oc,bcl->bol', w, xn) + b[None, :, None]


if __name__ == "__main__":
    key = jax.random.PRNGKey(0)
    k1, k2, k3, k4, k5 = jax.random.split(key, 5)

    # Case 1: small f32 smoke test (B=2, C=4, L=16).
    B, C, L = 2, 4, 16
    x = jax.random.normal(k1, (B, C, L), dtype=jnp.float32)
    # RMSNorm.__init__ sets g = ones(1, dim, 1); perturb deterministically so
    # the gain actually matters in the test.
    g = jnp.ones((1, C, 1), jnp.float32) + 0.1 * jax.random.normal(k2, (1, C, 1))
    w = 0.5 * jax.random.normal(k3, (C, C), dtype=jnp.float32)
    b = 0.1 * jax.random.normal(k4, (C,), dtype=jnp.float32)

    out = jax.block_until_ready(prenorm_conv1x1(x, g, w, b))
    ref = prenorm_reference(x, g, w, b)
    assert out.shape == (B, C, L)
    # bf16 MXU matmul (f32 accumulate) -> relaxed tolerance vs f32 reference.
    assert jnp.allclose(out, ref, atol=3e-2, rtol=3e-2), "case-1 mismatch vs reference"

    # Case 2: bf16 activations, C >= 128 tiling, L not a multiple of 128
    # (padding path), and the B == 1 grid-balance split.
    B2, C2, L2 = 1, 128, 200
    kx, kg, kw, kb = jax.random.split(k5, 4)
    x2 = jax.random.normal(kx, (B2, C2, L2), dtype=jnp.float32).astype(jnp.bfloat16)
    g2 = jnp.ones((1, C2, 1), jnp.float32) + 0.1 * jax.random.normal(kg, (1, C2, 1))
    w2 = 0.5 * jax.random.normal(kw, (C2, C2), dtype=jnp.float32)
    b2 = 0.1 * jax.random.normal(kb, (C2,), dtype=jnp.float32)

    out2 = jax.block_until_ready(prenorm_conv1x1(x2, g2, w2, b2))
    ref2 = prenorm_reference(x2.astype(jnp.float32), g2, w2, b2)
    assert out2.shape == (B2, C2, L2)
    assert out2.dtype == jnp.bfloat16
    assert jnp.allclose(out2.astype(jnp.float32), ref2, atol=2e-1, rtol=5e-2), \
        "case-2 mismatch vs reference"

    print("KERNEL_OK")
</pallas_src>

<mosaic_0001>
module attributes {stable_mosaic.version = 11 : i64} {
  func.func @_prenorm_kernel(%arg0: i32, %arg1: i32, %arg2: memref<1x4x128xf32, #tpu.memory_space<vmem>>, %arg3: memref<4x4xbf16, #tpu.memory_space<vmem>>, %arg4: memref<4x1xf32, #tpu.memory_space<vmem>>, %arg5: memref<1x4x128xf32, #tpu.memory_space<vmem>>) attributes {dimension_semantics = [#tpu.dimension_semantics<parallel>, #tpu.dimension_semantics<parallel>], iteration_bounds = array<i64: 2, 1>, scalar_prefetch = 0 : i64, scratch_operands = 0 : i64, tpu.core_type = #tpu.core_type<tc>, window_params = [{transform_indices = @transform_0, window_bounds = array<i64: 1, 4, 128>}, {pipeline_mode = #tpu.pipeline_mode<synchronous>, transform_indices = @transform_1, window_bounds = array<i64: 4, 4>}, {pipeline_mode = #tpu.pipeline_mode<synchronous>, transform_indices = @transform_2, window_bounds = array<i64: 4, 1>}, {transform_indices = @transform_3, window_bounds = array<i64: 1, 4, 128>}]} {
    %c0 = arith.constant 0 : index
    %c0_0 = arith.constant 0 : index
    %c0_1 = arith.constant 0 : index
    %0 = vector.load %arg2[%c0, %c0_0, %c0_1] : memref<1x4x128xf32, #tpu.memory_space<vmem>>, vector<1x4x128xf32>
    %1 = vector.shape_cast %0 : vector<1x4x128xf32> to vector<4x128xf32>
    %2 = arith.mulf %1, %1 : vector<4x128xf32>
    %cst = arith.constant dense<0.000000e+00> : vector<128xf32>
    %3 = vector.multi_reduction <add>, %2, %cst [0] : vector<4x128xf32> to vector<128xf32>
    %4 = vector.shape_cast %3 : vector<128xf32> to vector<1x128xf32>
    %cst_2 = arith.constant 1.000000e-24 : f32
    %5 = vector.broadcast %cst_2 : f32 to vector<1x128xf32>
    %6 = arith.maximumf %4, %5 : vector<1x128xf32>
    %7 = math.rsqrt %6 : vector<1x128xf32>
    %c0_3 = arith.constant 0 : index
    %c0_4 = arith.constant 0 : index
    %8 = vector.load %arg3[%c0_3, %c0_4] : memref<4x4xbf16, #tpu.memory_space<vmem>>, vector<4x4xbf16>
    %9 = arith.truncf %1 : vector<4x128xf32> to vector<4x128xbf16>
    %cst_5 = arith.constant dense<0.000000e+00> : vector<4x128xf32>
    %10 = tpu.matmul %8, %9, %cst_5 {dimension_numbers = #tpu.dot_dimension_numbers<[1], [0], [0], [1], [0, 0, 1, 1], [], []>} : vector<4x4xbf16>, vector<4x128xbf16>, vector<4x128xf32> -> vector<4x128xf32>
    %11 = vector.broadcast %7 : vector<1x128xf32> to vector<4x128xf32>
    %12 = arith.mulf %10, %11 : vector<4x128xf32>
    %c0_6 = arith.constant 0 : index
    %c0_7 = arith.constant 0 : index
    %13 = vector.load %arg4[%c0_6, %c0_7] : memref<4x1xf32, #tpu.memory_space<vmem>>, vector<4x1xf32>
    %14 = vector.broadcast %13 : vector<4x1xf32> to vector<4x128xf32>
    %15 = arith.addf %12, %14 : vector<4x128xf32>
    %c0_8 = arith.constant 0 : index
    %c0_9 = arith.constant 0 : index
    %c0_10 = arith.constant 0 : index
    %16 = vector.load %arg5[%c0_8, %c0_9, %c0_10] : memref<1x4x128xf32, #tpu.memory_space<vmem>>, vector<1x4x128xf32>
    %17 = vector.shape_cast %16 : vector<1x4x128xf32> to vector<4x128xf32>
    %18 = vector.shape_cast %15 : vector<4x128xf32> to vector<1x4x128xf32>
    tpu.vector_store %arg5[%c0_8, %c0_9, %c0_10], %18 {strides = array<i32>} : memref<1x4x128xf32, #tpu.memory_space<vmem>>, vector<1x4x128xf32>,
    return
  }
  func.func @transform_0(%arg0: i32, %arg1: i32) -> (i32, i32, i32) {
    %c0_i32 = arith.constant 0 : i32
    %c0_i32_0 = arith.constant 0 : i32
    return %arg0, %c0_i32, %arg1 : i32, i32, i32
  }
  func.func @transform_1(%arg0: i32, %arg1: i32) -> (i32, i32) {
    %c0_i32 = arith.constant 0 : i32
    %c0_i32_0 = arith.constant 0 : i32
    %c0_i32_1 = arith.constant 0 : i32
    return %c0_i32, %c0_i32_0 : i32, i32
  }
  func.func @transform_2(%arg0: i32, %arg1: i32) -> (i32, i32) {
    %c0_i32 = arith.constant 0 : i32
    %c0_i32_0 = arith.constant 0 : i32
    %c0_i32_1 = arith.constant 0 : i32
    return %c0_i32, %c0_i32_0 : i32, i32
  }
  func.func @transform_3(%arg0: i32, %arg1: i32) -> (i32, i32, i32) {
    %c0_i32 = arith.constant 0 : i32
    %c0_i32_0 = arith.constant 0 : i32
    return %arg0, %c0_i32, %arg1 : i32, i32, i32
  }
}

</mosaic_0001>

<bundles_post_ra>
// kernel: tpu_custom_call.1
= control target key start
LH: loop header
LB: loop body
LE: loop exit
PB: predicated region body
PF: predicated region fallthrough
CT: control target
= control target key end

     0   :  { %8 = vsyncpa [#allocation3], 0  ;;  %s751_s0 = inlined_call_operand.hbm [shape: f32[2,4,128], index: 0, kind: input, shape index: {}]   ;;  %s752_s1 = inlined_call_operand.vmem [shape: bf16[4,4], index: 1, kind: input, shape index: {}]   ;;  %s753_s2 = inlined_call_operand.vmem [shape: f32[4,1], index: 2, kind: input, shape index: {}]   ;;  %s754_s3 = inlined_call_operand.hbm [shape: f32[2,4,128], index: 3, kind: output, shape index: {}]  }
   0x1   :  { %10 = vsyncpa [#allocation3 + $0x1], 0 }
   0x2   :  { %11 = vsyncpa [#allocation4], 0 }
   0x3   :  { %13 = vsyncpa [#allocation4 + $0x1], 0  ;;  %s595_s12 = smov 0   ;;  %s597_s13 = smov 0  }
   0x4   :  { %s599_s14 = smov 0   ;;  %s601_s15 = smov 0  }
   0x5   :  { %s603_s16 = smov 0   ;;  %s605_s17 = smov 0  }
   0x6 LB: > { %s370_s18 = sadd.s32 4294967295, %s568_s17   ;;  %s371_s19 = sadd.s32 4294967294, %s568_s17   ;;  %s568_s17 = sphi %s605_s17, %s19_s17   ;;  %s564_s16 = sphi %s603_s16, %s766_s16   ;;  %s560_s15 = sphi %s601_s15, %s765_s15   ;;  %s556_s14 = sphi %s599_s14, %s764_s14   ;;  %s552_s13 = sphi %s597_s13, %s763_s13   ;;  %s548_s12 = sphi %s595_s12, %s762_s12  }
   0x7   : > { %s31_s20 = sadd.s32 1, %s564_s16  ;;  %s40_s21 = sadd.s32 1, %s556_s14 }
   0x8   : > { %p33_p0 = scmp.ge.s32.totalorder %s31_s20, 2  ;;  %p47_p1 = scmp.ne.s32.totalorder %s556_s14, %s552_s13 }
   0x9   : > { %p48_p2 = scmp.eq.s32.totalorder %s568_s17, 0  ;;  %p53_p3 = scmp.ne.s32.totalorder %s552_s13, %s548_s12 }
   0xa   : > { %s768_s20 = smov (%p33_p0, %s31_s20), 0  ;;  %p54_p5 = scmp.eq.s32.totalorder %s370_s18, 0 }
   0xb   : > { %p636_p4 = por %p48_p2, %p47_p1  ;;  %s35_s23 = ssub.s32 %s564_s16, %s768_s20 }
   0xc   : > { %p121_p6 = scmp.eq.s32.totalorder %s370_s18, 1  ;;  %p38_p7 = scmp.eq.s32.totalorder %s35_s23, 0 }
   0xd   : > { %p642_p8 = por %p54_p5, %p53_p3  ;;  %p127_p10 = scmp.eq.s32.totalorder %s371_s19, 1 }
   0xe   : > { %p646_p9 = por %p121_p6, %p47_p1  ;;  %p404_p13 = scmp.lt.s32.totalorder %s568_s17, 2 }
   0xf   : > { %s651_s26 = scalar_select %p38_p7, %s556_s14, %s40_s21  }
  0x10   : > { %p653_p11 = por %p127_p10, %p53_p3  ;;  %s153_s28 = sand.u32 1, %s556_s14  }
  0x11   : > { %s374_s29 = sshll.u32 %s153_s28, 2  ;;  %s375_s30 = sshll.u32 %s564_s16, 6 }
  0x12   : > { %s758_s27 = scalar_select %p653_p11, 1, 0 }
  0x13   : > { %s163_s6 = scalar_lea.hbm %s751_s0, %s375_s30  ;;  %s157_s7 = scalar_lea.vmem [#allocation2], %s374_s29 }
  0x14   : > { %s165_s8 = sshll.u32 %s157_s7, 4  ;;  %p666_p0 = pnand %p404_p13, %p636_p4  ;;  %s166_s8 = int_to_ptr.vmem [resolvable:$true] %s165_s8 }
  0x15   : > { %p376_p1 = scmp.ge.s32.totalorder %s568_s17, 1  ;;  %p170_p2 = scmp.lt.s32.totalorder %s568_s17, 3 }
  0x16   : > { %s154_s10 = scalar_lea.sflag [#allocation3], %s153_s28  ;;  %p462_p3 = pneg %p666_p0 }
  0x17   : > { %s473_s11 = scalar_lea.vmem %s166_s8, 64  ;;  %s570_s18 = smov [#allocation2]  }
  0x18   : > { %p474_p5 = scmp.ne.s32.totalorder %s166_s8, %s473_s11  ;;  %s478_s19 = sshll.u32 %s570_s18, 4  ;;  %s479_s19 = int_to_ptr.vmem [resolvable:$false] %s478_s19 }
  0x19   : > { %s480_s21 = scalar_lea.vmem %s479_s19, 128  ;;  %p481_p10 = scmp.lt.s32.totalorder %s166_s8, %s479_s19 }
  0x1a   : > { %p476_p6 = pnand %p474_p5, %p462_p3  ;;  %p482_p12 = scmp.lt.s32.totalorder %s480_s21, %s473_s11 }
  0x1c   : > { %p477_p7 = pneg %p476_p6  ;;  %p483_p4 = por %p482_p12, %p481_p10 }
  0x1e   : > { %p484_p13 = pnand %p483_p4, %p477_p7 }
  0x20   : > { %487 = shalt.err (!%p484_p13)
}
  0x21   : > { %399 = dma.hbm_to_vmem [thread:$0]  (!%p666_p0), %s163_s6, 64, %s166_s8, %s154_s10  }
  0x22   : > { %p171_p11 = pnand %p376_p1, %p170_p2 }
  0x23   : > { %s681_s22 = sand.u32 (!%p171_p11), 1, %s552_s13  }
  0x24   : > { %174 = sbr.rel (%p171_p11) target bundleno = 260 (0x104), region = 32  ;;  %s377_s23 = sshll.u32 (!%p171_p11), %s681_s22, 2 }
  0x25   : > { %s177_s28 = scalar_lea.sflag (!%p171_p11), [#allocation3], %s681_s22  ;;  %s180_s29 = scalar_lea.vmem (!%p171_p11), [#allocation2], %s377_s23 }
  0x29   : > { %539 = dma.done.wait (%p642_p8), %s177_s28, 64  }
  0x2a   : > { %541 = vsyncadd (%p642_p8), %s177_s28, 4294967232  ;;  %v571_v0 = vmov 0.0   ;;  %vm572_vm0 = vmmov 0   ;;  %v573_v1 = vmov 0   ;;  %v204_v2 = vld [vmem:[%s180_s29] sm:$0xf] }
  0x2b   : > { %386 = vmatprep.subr.bf16.mxu0 %v571_v0  ;;  %388 = vmatprep.mubr.msk.bf16.mxu0 %vm572_vm0, %v571_v0  ;;  %vm222_vm1 = vcmask 1041408   ;;  %v267_v3 = vld [vmem:[%s753_s2] sm:$0xf]  ;;  %v217_v4 = vpack.c.bf16 %v204_v2, %v204_v2  ;;  %vm218_vm2 = vcmask 31744   ;;  %v205_v7 = vmul.f32 %v204_v2, %v204_v2  ;;  %s381_s24 = sshll.u32 %s560_s15, 6  ;;  %s202_s7 = scalar_lea.vmem [#allocation5], %s377_s23 }
  0x2c   : > { %457 = vset.pattern.permute.xlu0 %v573_v1  ;;  %v216_v6 = vld [vmem:[%s752_s1] sm:$0x3]  ;;  %vm206_vm3 = vcmask 1043456   ;;  %s290_s8 = sshll.u32 %s202_s7, 4  ;;  %s703_s11 = scalar_lea.hbm %s754_s3, %s381_s24  ;;  %s705_s8 = int_to_ptr.vmem [resolvable:$true] %s290_s8 }
  0x2d   : > { %270 = vperm.xlu0 %457, %v267_v3   ;;  %v224_v5 = vsel %vm222_vm1, %v217_v4, 0  ;;  %v207_v8 = vsel %vm206_vm3, %v205_v7, 0.0  ;;  %s276_s15 = scalar_lea.sflag [#allocation4], %s681_s22  ;;  %s488_s18 = scalar_lea.vmem %s705_s8, 64 }
  0x2e   : > { %387 = vmatpush3.bf16.msra.mxu0 %v224_v5  ;;  %v208_v9 = vrot.slane %v207_v8, 4  ;;  %p489_p8 = scmp.ne.s32.totalorder %s705_s8, %s488_s18  ;;  %s574_s19 = smov [#allocation5]  }
  0x2f   : > { %s492_s21 = sshll.u32 %s574_s19, 4  ;;  %s493_s21 = int_to_ptr.vmem [resolvable:$false] %s492_s21 }
  0x30   : > { %v209_v10 = vadd.f32 %v208_v9, %v207_v8  ;;  %p490_p11 = pnand %p489_p8, %p646_p9  ;;  %s494_s23 = scalar_lea.vmem %s493_s21, 128 }
  0x31   : > { %389 = vmatmul.mubr.msk.bf16.vlgmr.msra.gmra.mxu0 %vm218_vm2, %v216_v6  ;;  %p495_p0 = scmp.lt.s32.totalorder %s705_s8, %s493_s21  ;;  %p496_p1 = scmp.lt.s32.totalorder %s494_s23, %s488_s18 }
  0x32   : > { %v210_v11 = vrot.slane %v209_v10, 2  ;;  %p491_p12 = pneg %p490_p11 }
  0x33   : > { %p497_p2 = por %p496_p1, %p495_p0 }
  0x34   : > { %v211_v12 = vadd.f32 %v210_v11, %v209_v10 }
  0x35   : > { %p498_p3 = pnand %p497_p2, %p491_p12 }
  0x36   : > { %v212_v13 = vrot.slane %v211_v12, 1 }
  0x38   : > { %v213_v14 = vadd.f32 %v212_v13, %v211_v12 }
  0x3a   : > { %v214_v15 = vmax.f32 %v213_v14, 1e-24 }
  0x3c   : > { %458 = vrsqrt.f32 %v214_v15 }
  0x49   : > { %v459_v16 = vpop.eup %458 }
  0xa8   : > { %v271_v18 = vpop.permute.xlu0 %270 }
  0xf1   : > { %v260_v17 = vpop.f32.mrf.mxu0 }
  0xf2   : > { %v266_v19 = vmul.f32 %v459_v16, %v260_v17 }
  0xf3   : > { %v390_v20 = vpop.f32.mrf.mxu0 }
  0xf4   : > { %v273_v21 = vadd.f32 %v271_v18, %v266_v19 }
  0xf5   : > { %v263_v22 = vpop.f32.mrf.mxu0 }
  0xf6   : > { %274 = vst [vmem:[%s202_s7] sm:$0xf] %v273_v21 }
  0xf7   : > { %v391_v23 = vpop.f32.mrf.mxu0 }
  0xf8   : > { %501 = shalt.err (!%p498_p3)
}
  0xf9   : > { %s502_s28 = scalar_lea.hbm %s703_s11, 64  ;;  %s506_s30 = scalar_lea.hbm %s754_s3, 128 }
  0xfa   : > { %p503_p5 = scmp.ne.s32.totalorder %s703_s11, %s502_s28  ;;  %p507_p10 = scmp.lt.s32.totalorder %s703_s11, %s754_s3 }
  0xfb   : > { %p508_p4 = scmp.lt.s32.totalorder %s506_s30, %s502_s28 }
  0xfc   : > { %p504_p6 = pnand %p503_p5, %p646_p9 }
  0xfd   : > { %p509_p13 = por %p508_p4, %p507_p10 }
  0xfe   : > { %p505_p7 = pneg %p504_p6 }
 0x100   : > { %p510_p8 = pnand %p509_p13, %p505_p7 }
 0x102   : > { %513 = shalt.err (!%p510_p8)
}
 0x103   : > { %394 = dma.vmem_to_hbm [thread:$0]  (%p646_p9), %s705_s8, 64, %s703_s11, %s276_s15  }
 0x104 PF: > { %s302_s6 = sand.u32 1, %s548_s12   ;;  %p760_p11 = scmp.ne.s32.totalorder %s758_s27, 0 }
 0x105   : > { %p761_p12 = scmp.ge.s32.totalorder %s568_s17, 2  ;;  %s303_s24 = scalar_lea.sflag [#allocation4], %s302_s6 }
 0x107   : > { %p401_p0 = pnand %p761_p12, %p760_p11 }
 0x109   : > { %p402_p1 = pneg %p401_p0 }
 0x10b   : > { %543 = dma.done.wait (%p402_p1), %s303_s24, 64  }
 0x10c   : > { %545 = vsyncadd (%p402_p1), %s303_s24, 4294967232  ;;  %s19_s17 = sadd.s32 1, %s568_s17   ;;  %s762_s12 = smov %s552_s13 }
 0x10d   : > { %p16_p2 = scmp.ge.s32.totalorder %s19_s17, 4   ;;  %s763_s13 = smov %s556_s14 }
 0x10e   : > { %s764_s14 = smov %s651_s26  ;;  %s765_s15 = smov %s564_s16 }
 0x10f   : > { %s766_s16 = smov %s768_s20  ;;  %18 = sbr.rel (!%p16_p2) target bundleno = 6 (0x6), region = 77 }
 0x114   :  { %308 = vsyncpa [#allocation3], 1 }
 0x115   :  { %310 = vsyncpa [#allocation3 + $0x1], 1 }
 0x116   :  { %311 = vsyncpa [#allocation4], 1 }
 0x117   :  { %313 = vsyncpa [#allocation4 + $0x1], 1 }

</bundles_post_ra>
